<compile_context>
chip_gen: v7x
topology: tpu7x:2x2x1
jax: 0.10.0
libtpu: 0.0.40
codegen_flags: <defaults>
</compile_context>

<pallas_src>
import functools

import jax
import jax.numpy as jnp
from jax.experimental import pallas as pl
from jax.experimental.pallas import tpu as pltpu


def _round_up(x: int, m: int) -> int:
    return ((x + m - 1) // m) * m


def _min_sublane(dtype) -> int:
    # f32 -> 8, bf16 -> 16, int8/fp8 -> 32 (packed sublane minimums)
    return 8 * (4 // max(1, jnp.dtype(dtype).itemsize))


def _make_linear_kernel(has_bias: bool, use_scratch: bool):
    """Kernel factory. Static layout:
       refs = (x, w, [bias,] out, [acc_scratch])
    When `use_scratch` is False (f32 output) the output ref itself is the
    f32 accumulator, saving the scratch buffer and the final copy/cast."""

    def kernel(*refs):
        if use_scratch:
            io_refs, acc_ref = refs[:-1], refs[-1]
        else:
            io_refs, acc_ref = refs, refs[-1]          # o_ref doubles as acc
        if has_bias:
            x_ref, w_ref, b_ref, o_ref = io_refs
        else:
            x_ref, w_ref, o_ref = io_refs
            b_ref = None

        k = pl.program_id(2)

        @pl.when(k == 0)
        def _():
            acc_ref[...] = jnp.zeros_like(acc_ref)

        acc_ref[...] += jnp.dot(
            x_ref[...], w_ref[...], preferred_element_type=jnp.float32
        )

        @pl.when(k == pl.num_programs(2) - 1)
        def _():
            out = acc_ref[...]
            if has_bias:
                out = out + b_ref[...]                 # bias once, in epilogue
            o_ref[...] = out.astype(o_ref.dtype)

    return kernel


@functools.partial(
    jax.jit, static_argnames=("tile_m", "tile_n", "tile_k", "compute_dtype")
)
def linear_forward(x, weight, bias=None, *,
                   tile_m: int = 512, tile_n: int = 512, tile_k: int = 1024,
                   compute_dtype=None):
    """y = x @ weight.T + bias   (PyTorch nn.Linear forward).

    x: [..., K];  weight: [N, K] (PyTorch layout);  bias: [N] or None.
    Returns [..., N] in x's dtype.  Pass compute_dtype=jnp.bfloat16 to force
    bf16 operands with f32 accumulation (auto-enabled for large shapes).
    """
    *lead, K = x.shape
    N, K2 = weight.shape
    assert K == K2, "in_features mismatch between x and weight"
    out_dtype = x.dtype

    x2 = x.reshape(-1, K)
    M = x2.shape[0]

    # bf16 operands by default for large shapes: MXU-native on v5e/v6e/v7x
    # and halves HBM traffic (the binding resource at these tile sizes).
    if compute_dtype is None and x.dtype == jnp.float32 and min(M, N, K) >= 1024:
        compute_dtype = jnp.bfloat16
    if compute_dtype is not None:
        x2 = x2.astype(compute_dtype)
        weight = weight.astype(compute_dtype)

    in_dtype = x2.dtype
    sub = _min_sublane(in_dtype)

    # Tile sizes: large for arithmetic intensity, auto-shrunk for small
    # shapes; tn stays a multiple of 128 so output stores are lane-dense.
    tm = min(tile_m, _round_up(M, sub))
    tn = min(tile_n, _round_up(N, 128))
    tk = min(tile_k, _round_up(K, 128))

    # v7x megacore: expose >= 2 parallel (i, j) blocks when possible so both
    # TensorCores get work (harmless on 1-TC v5e/v6e).
    if pl.cdiv(M, tm) * pl.cdiv(N, tn) < 2:
        if N > 128:
            tn = _round_up(pl.cdiv(N, 2), 128)
        elif M > sub:
            tm = _round_up(pl.cdiv(M, 2), sub)

    # One-time [N, K] -> [K, N] transpose in HBM: the kernel then does a
    # plain row-major matmul with no per-tile weight transpose.
    w_t = weight.T

    # Only K needs zero-padding (a partial K block would accumulate garbage
    # into valid outputs). Partial M/N edge blocks are left to Pallas: their
    # garbage only reaches output rows/cols that are never written back.
    Kp = _round_up(K, tk)
    if Kp != K:
        x2 = jnp.pad(x2, ((0, 0), (0, Kp - K)))
        w_t = jnp.pad(w_t, ((0, Kp - K), (0, 0)))

    has_bias = bias is not None
    use_scratch = out_dtype != jnp.float32   # f32 outputs accumulate in-place

    grid = (pl.cdiv(M, tm), pl.cdiv(N, tn), Kp // tk)

    # TODO(synk): on v7x, sweep pipeline_mode=pl.Buffered(3) on x/W specs if
    # DMA shows up exposed at small tk (3.2 TB/s per TC shortens compute/byte).
    in_specs = [
        pl.BlockSpec((tm, tk), lambda i, j, k: (i, k)),   # x tile
        pl.BlockSpec((tk, tn), lambda i, j, k: (k, j)),   # W^T tile
    ]
    inputs = [x2, w_t]
    if has_bias:
        in_specs.append(pl.BlockSpec((1, tn), lambda i, j, k: (0, j)))
        inputs.append(bias.astype(jnp.float32).reshape(1, N))

    scratch_shapes = [pltpu.VMEM((tm, tn), jnp.float32)] if use_scratch else []

    # Derived VMEM budget: double-buffered x/W/out/bias tiles + accumulator,
    # with 2x headroom for compiler-internal scratch (capped well under the
    # 64 MiB physical VMEM of v7x).
    isz = jnp.dtype(in_dtype).itemsize
    osz = jnp.dtype(out_dtype).itemsize
    est = (2 * (tm * tk * isz + tk * tn * isz + tm * tn * osz
                + (tn * 4 if has_bias else 0))
           + (tm * tn * 4 if use_scratch else 0))
    vmem_limit = int(min(max(2 * est, 32 * 1024 * 1024), 100 * 1024 * 1024))

    kernel = _make_linear_kernel(has_bias, use_scratch)

    out2 = pl.pallas_call(
        kernel,
        out_shape=jax.ShapeDtypeStruct((M, N), out_dtype),
        grid_spec=pltpu.PrefetchScalarGridSpec(
            num_scalar_prefetch=0,
            grid=grid,
            in_specs=in_specs,
            out_specs=pl.BlockSpec((tm, tn), lambda i, j, k: (i, j)),
            scratch_shapes=scratch_shapes,
        ),
        compiler_params=pltpu.CompilerParams(
            dimension_semantics=("parallel", "parallel", "arbitrary"),
            vmem_limit_bytes=vmem_limit,
        ),
    )(*inputs)

    return out2.reshape(*lead, N)


def xavier_normal(key, out_features, in_features, dtype=jnp.float32):
    # matches nn.init.xavier_normal_ (gain=1): std = sqrt(2/(fan_in+fan_out))
    std = (2.0 / (in_features + out_features)) ** 0.5
    return std * jax.random.normal(key, (out_features, in_features), dtype=dtype)


if __name__ == "__main__":
    in_features, out_features = 32, 64
    batch = 8

    key = jax.random.PRNGKey(0)
    kx, kw = jax.random.split(key)

    x = jax.random.normal(kx, (batch, in_features), dtype=jnp.float32)
    weight = xavier_normal(kw, out_features, in_features)     # [out, in]
    bias = jnp.zeros((out_features,), dtype=jnp.float32)      # nn.init.zeros_

    out = jax.block_until_ready(linear_forward(x, weight, bias))
    ref = x @ weight.T + bias
    assert out.shape == (batch, out_features)
    assert jnp.allclose(out, ref, atol=1e-5, rtol=1e-5)

    # non-tile-aligned / multi-K-block shape (exercises K padding + partial
    # M/N edge blocks + megacore tn split), with bias
    x2 = jax.random.normal(kx, (37, 300), dtype=jnp.float32)
    w2 = xavier_normal(kw, 200, 300)
    b2 = jnp.ones((200,), dtype=jnp.float32)
    out2 = jax.block_until_ready(linear_forward(x2, w2, b2, tile_k=128))
    ref2 = x2 @ w2.T + b2
    assert jnp.allclose(out2, ref2, atol=1e-4, rtol=1e-4)

    # no-bias branch + leading batch dims (nn.Linear applies to [..., K])
    x3 = jax.random.normal(kx, (2, 5, in_features), dtype=jnp.float32)
    out3 = jax.block_until_ready(linear_forward(x3, weight, None))
    ref3 = x3 @ weight.T
    assert out3.shape == (2, 5, out_features)
    assert jnp.allclose(out3, ref3, atol=1e-5, rtol=1e-5)

    print("KERNEL_OK")
</pallas_src>

<mosaic_0001>
module attributes {stable_mosaic.version = 11 : i64} {
  func.func @kernel(%arg0: i32, %arg1: i32, %arg2: i32, %arg3: memref<8x128xf32, #tpu.memory_space<vmem>>, %arg4: memref<128x128xf32, #tpu.memory_space<vmem>>, %arg5: memref<1x128xf32, #tpu.memory_space<vmem>>, %arg6: memref<8x128xf32, #tpu.memory_space<vmem>>) attributes {dimension_semantics = [#tpu.dimension_semantics<parallel>, #tpu.dimension_semantics<parallel>, #tpu.dimension_semantics<arbitrary>], iteration_bounds = array<i64: 1, 1, 1>, scalar_prefetch = 0 : i64, scratch_operands = 0 : i64, tpu.core_type = #tpu.core_type<tc>, window_params = [{transform_indices = @transform_0, window_bounds = array<i64: 8, 128>}, {transform_indices = @transform_1, window_bounds = array<i64: 128, 128>}, {transform_indices = @transform_2, window_bounds = array<i64: 1, 128>}, {transform_indices = @transform_3, window_bounds = array<i64: 8, 128>}]} {
    %c0_i32 = arith.constant 0 : i32
    %0 = arith.cmpi eq, %arg2, %c0_i32 : i32
    %1 = arith.extui %0 : i1 to i32
    %c0_i32_0 = arith.constant 0 : i32
    %2 = arith.cmpi ne, %1, %c0_i32_0 : i32
    scf.if %2 {
      %cst_10 = arith.constant 0.000000e+00 : f32
      %12 = vector.broadcast %cst_10 : f32 to vector<8x128xf32>
      %c0_11 = arith.constant 0 : index
      %c0_12 = arith.constant 0 : index
      %13 = vector.load %arg6[%c0_11, %c0_12] : memref<8x128xf32, #tpu.memory_space<vmem>>, vector<8x128xf32>
      tpu.vector_store %arg6[%c0_11, %c0_12], %12 {strides = array<i32>} : memref<8x128xf32, #tpu.memory_space<vmem>>, vector<8x128xf32>,
    } else {
    }
    %c0 = arith.constant 0 : index
    %c0_1 = arith.constant 0 : index
    %3 = vector.load %arg6[%c0, %c0_1] : memref<8x128xf32, #tpu.memory_space<vmem>>, vector<8x128xf32>
    %c0_2 = arith.constant 0 : index
    %c0_3 = arith.constant 0 : index
    %4 = vector.load %arg3[%c0_2, %c0_3] : memref<8x128xf32, #tpu.memory_space<vmem>>, vector<8x128xf32>
    %c0_4 = arith.constant 0 : index
    %c0_5 = arith.constant 0 : index
    %5 = vector.load %arg4[%c0_4, %c0_5] : memref<128x128xf32, #tpu.memory_space<vmem>>, vector<128x128xf32>
    %cst = arith.constant dense<0.000000e+00> : vector<8x128xf32>
    %6 = tpu.matmul %4, %5, %cst {dimension_numbers = #tpu.dot_dimension_numbers<[1], [0], [0], [1], [0, 0, 1, 1], [], []>} : vector<8x128xf32>, vector<128x128xf32>, vector<8x128xf32> -> vector<8x128xf32>
    %7 = arith.addf %3, %6 : vector<8x128xf32>
    %c0_6 = arith.constant 0 : index
    %c0_7 = arith.constant 0 : index
    %8 = vector.load %arg6[%c0_6, %c0_7] : memref<8x128xf32, #tpu.memory_space<vmem>>, vector<8x128xf32>
    tpu.vector_store %arg6[%c0_6, %c0_7], %7 {strides = array<i32>} : memref<8x128xf32, #tpu.memory_space<vmem>>, vector<8x128xf32>,
    %c0_i32_8 = arith.constant 0 : i32
    %9 = arith.cmpi eq, %arg2, %c0_i32_8 : i32
    %10 = arith.extui %9 : i1 to i32
    %c0_i32_9 = arith.constant 0 : i32
    %11 = arith.cmpi ne, %10, %c0_i32_9 : i32
    scf.if %11 {
      %c0_10 = arith.constant 0 : index
      %c0_11 = arith.constant 0 : index
      %12 = vector.load %arg6[%c0_10, %c0_11] : memref<8x128xf32, #tpu.memory_space<vmem>>, vector<8x128xf32>
      %c0_12 = arith.constant 0 : index
      %c0_13 = arith.constant 0 : index
      %13 = vector.load %arg5[%c0_12, %c0_13] : memref<1x128xf32, #tpu.memory_space<vmem>>, vector<1x128xf32>
      %14 = vector.broadcast %13 : vector<1x128xf32> to vector<8x128xf32>
      %15 = arith.addf %12, %14 : vector<8x128xf32>
      %c0_14 = arith.constant 0 : index
      %c0_15 = arith.constant 0 : index
      %16 = vector.load %arg6[%c0_14, %c0_15] : memref<8x128xf32, #tpu.memory_space<vmem>>, vector<8x128xf32>
      tpu.vector_store %arg6[%c0_14, %c0_15], %15 {strides = array<i32>} : memref<8x128xf32, #tpu.memory_space<vmem>>, vector<8x128xf32>,
    } else {
    }
    return
  }
  func.func @transform_0(%arg0: i32, %arg1: i32, %arg2: i32) -> (i32, i32) {
    %c0_i32 = arith.constant 0 : i32
    return %arg0, %arg2 : i32, i32
  }
  func.func @transform_1(%arg0: i32, %arg1: i32, %arg2: i32) -> (i32, i32) {
    %c0_i32 = arith.constant 0 : i32
    return %arg2, %arg1 : i32, i32
  }
  func.func @transform_2(%arg0: i32, %arg1: i32, %arg2: i32) -> (i32, i32) {
    %c0_i32 = arith.constant 0 : i32
    %c0_i32_0 = arith.constant 0 : i32
    return %c0_i32, %arg1 : i32, i32
  }
  func.func @transform_3(%arg0: i32, %arg1: i32, %arg2: i32) -> (i32, i32) {
    %c0_i32 = arith.constant 0 : i32
    return %arg0, %arg1 : i32, i32
  }
}

</mosaic_0001>

<bundles_post_ra>
// kernel: linear_forward.1
= control target key start
LH: loop header
LB: loop body
LE: loop exit
PB: predicated region body
PF: predicated region fallthrough
CT: control target
= control target key end

     0   :  { %v242_v3 = vmov 0.0|0.0   ;;  %vm243_vm0 = vmmov 0   ;;  %v244_v6 = vmov 0.0   ;;  %s332_s0 = inlined_call_operand.vmem [shape: f32[8,128], index: 0, kind: input, shape index: {}]   ;;  %s333_s1 = inlined_call_operand.vmem [shape: f32[128,64], index: 1, kind: input, shape index: {}]   ;;  %s334_s2 = inlined_call_operand.vmem [shape: f32[1,64], index: 2, kind: input, shape index: {}]   ;;  %s335_s3 = inlined_call_operand.hbm [shape: f32[8,64], index: 3, kind: output, shape index: {}]  }
   0x1   :  { %v22_v0 = vld [vmem:[%s333_s1] sm:$0xff]  ;;  %v23_v1 = vld [vmem:[%s333_s1 + $0x8] sm:$0xff]  ;;  %v24_v2 = vld [vmem:[%s333_s1 + $0x10] sm:$0xff]  ;;  %190 = vmatprep.subr.bf16.mxu0 %v242_v3  ;;  %187 = vmatprep.mubr.msk.f32.mxu0 %vm243_vm0, %v244_v6 }
   0x2   :  { %v191_v4 = vpack.c.bf16 %v23_v1, %v22_v0  ;;  %v25_v5 = vld [vmem:[%s333_s1 + $0x18] sm:$0xff]  ;;  %v26_v8 = vld [vmem:[%s333_s1 + $0x20] sm:$0xff]  ;;  %v27_v9 = vld [vmem:[%s333_s1 + $0x28] sm:$0xff] }
   0x3   :  { %v194_v7 = vpack.c.bf16 %v25_v5, %v24_v2 }
   0x4   :  { %192 = vmatpush3.bf16.msra.mxu0 %v191_v4 }
   0x5   :  { %193 = vmatprep.subr.bf16.mxu0 %v242_v3 }
   0x6   :  { %8 = vsyncpa [#allocation3], 0  ;;  %v197_v10 = vpack.c.bf16 %v27_v9, %v26_v8  ;;  %v28_v11 = vld [vmem:[%s333_s1 + $0x30] sm:$0xff]  ;;  %v29_v12 = vld [vmem:[%s333_s1 + $0x38] sm:$0xff]  ;;  %s245_s21 = smov [#allocation2]  }
   0x7   :  { %v200_v13 = vpack.c.bf16 %v29_v12, %v28_v11  ;;  %v30_v14 = vld [vmem:[%s333_s1 + $0x40] sm:$0xff]  ;;  %v31_v15 = vld [vmem:[%s333_s1 + $0x48] sm:$0xff]  ;;  %v32_v17 = vld [vmem:[%s333_s1 + $0x50] sm:$0xff]  ;;  %s129_s22 = sshll.u32 %s245_s21, 4  ;;  %s130_s22 = int_to_ptr.vmem [resolvable:$true] %s129_s22 }
   0x8   :  { %195 = vmatpush3.bf16.msra.mxu0 %v194_v7  ;;  %v203_v16 = vpack.c.bf16 %v31_v15, %v30_v14  ;;  %v33_v18 = vld [vmem:[%s333_s1 + $0x58] sm:$0xff]  ;;  %v34_v20 = vld [vmem:[%s333_s1 + $0x60] sm:$0xff]  ;;  %v35_v21 = vld [vmem:[%s333_s1 + $0x68] sm:$0xff]  ;;  %p223_p1 = scmp.lt.s32.totalorder %s130_s22, %s130_s22 }
   0x9   :  { %196 = vmatprep.subr.bf16.mxu0 %v242_v3  ;;  %v206_v19 = vpack.c.bf16 %v33_v18, %v32_v17  ;;  %v209_v22 = vpack.c.bf16 %v35_v21, %v34_v20  ;;  %v36_v23 = vld [vmem:[%s333_s1 + $0x70] sm:$0xff]  ;;  %v37_v24 = vld [vmem:[%s333_s1 + $0x78] sm:$0xff]  ;;  %v21_v26 = vld [vmem:[%s332_s0] sm:$0xff]  ;;  %s218_s1 = scalar_lea.vmem %s130_s22, 128 }
   0xa   :  { %v212_v25 = vpack.c.bf16 %v37_v24, %v36_v23  ;;  %v137_v28 = vld [vmem:[%s334_s2] ss:$0 sm:$0xff]  ;;  %p219_p0 = scmp.ne.s32.totalorder %s130_s22, %s218_s1  ;;  %p224_p2 = scmp.lt.s32.totalorder %s218_s1, %s218_s1 }
   0xc   :  { %198 = vmatpush3.bf16.msra.mxu0 %v197_v10  ;;  %p225_p3 = por %p224_p2, %p223_p1 }
   0xd   :  { %199 = vmatprep.subr.bf16.mxu0 %v242_v3 }
   0xe   :  { %p226_p4 = pnand %p225_p3, %p219_p0 }
  0x10   :  { %201 = vmatpush3.bf16.msra.mxu0 %v200_v13 }
  0x11   :  { %202 = vmatprep.subr.bf16.mxu0 %v242_v3 }
  0x14   :  { %204 = vmatpush3.bf16.msra.mxu0 %v203_v16 }
  0x15   :  { %205 = vmatprep.subr.bf16.mxu0 %v242_v3 }
  0x18   :  { %207 = vmatpush3.bf16.msra.mxu0 %v206_v19 }
  0x19   :  { %208 = vmatprep.subr.bf16.mxu0 %v242_v3 }
  0x1c   :  { %210 = vmatpush3.bf16.msra.mxu0 %v209_v22 }
  0x1d   :  { %211 = vmatprep.subr.bf16.mxu0 %v242_v3 }
  0x20   :  { %213 = vmatpush3.bf16.msra.mxu0 %v212_v25 }
  0x23   :  { %188 = vmatmul.mubr.f32.vlgmr.msra.gmra.mrb[0].mxu0 %v21_v26 }
  0xf6   :  { %v104_v27 = vpop.f32.mrb[0].mxu0 }
  0xf7   :  { %v189_v29 = vpop.f32.mrb[1].mxu0  ;;  %v121_v30 = vadd.f32 %v137_v28, %v104_v27 }
  0xf9   :  { %122 = vst [vmem:[#allocation2] sm:$0xff] %v121_v30 }
  0xfa   :  { %229 = shalt.err (!%p226_p4)
}
  0xfb   :  { %s230_s24 = scalar_lea.hbm %s335_s3, 128 }
  0xfc   :  { %p231_p5 = scmp.ne.s32.totalorder %s335_s3, %s230_s24  ;;  %p234_p6 = scmp.lt.u32.totalorder %s230_s24, %s335_s3 }
  0xfe   :  { %p236_p7 = pnand %p234_p6, %p231_p5 }
 0x100   :  { %239 = shalt.err (!%p236_p7)
}
 0x101   :  { %132 = dma.vmem_to_hbm [thread:$0]  %s130_s22, 128, %s335_s3, [#allocation3]  }
 0x102   :  { %240 = dma.done.wait [#allocation3], 128  }
 0x103   :  { %241 = vsyncadd [#allocation3], 4294967168 }
 0x104   :  { %136 = vsyncpa [#allocation3], 1 }

</bundles_post_ra>
